<compile_context>
chip_gen: v6e
topology: v6e:2x2x1
jax: 0.10.0
libtpu: 0.0.40
codegen_flags: <defaults>
</compile_context>

<pallas_src>
import jax
import jax.numpy as jnp
from jax.experimental import pallas as pl
from jax.experimental.pallas import tpu as pltpu


def _softplus(x):
    # matches torch.nn.functional.softplus (threshold=20)
    return jnp.where(x > 20.0, x, jnp.log1p(jnp.exp(jnp.minimum(x, 20.0))))


def _pick_tile(total, max_tile):
    """Largest lane-dense tile (multiple of 128) dividing `total`, else full."""
    if total <= max_tile:
        return total
    t = max_tile - (max_tile % 128)
    while t >= 128:
        if total % t == 0:
            return t
        t -= 128
    return total


# ----------------------------------------------------------------------------
# Kernel 1: fused 1x1 conv + gaussian activations (channel-major, lane-dense)
# ----------------------------------------------------------------------------
def gaussian_head_kernel(x_ref, w_ref, b_ref, o_ref):
    # x_ref: (1, 14, TS)  features, lane axis = spatial
    # w_ref: (14, 14)     conv weight (out_ch, in_ch)
    # b_ref: (14, 1)      conv bias (broadcast over lanes)
    # TODO(synk): if the UNet emits bf16, accept bf16 here (upcast right after
    # load) to halve input HBM traffic; kept f32 to match the torch module.
    x = x_ref[0].astype(jnp.float32)                             # (14, TS)
    y = jnp.dot(w_ref[...], x, preferred_element_type=jnp.float32) + b_ref[...]

    # pos: clamp(-1, 1)
    o_ref[0, 0:3, :] = jnp.clip(y[0:3], -1.0, 1.0)
    # opacity: sigmoid (EUP exp on 1 channel only)
    o_ref[0, 3:4, :] = jax.nn.sigmoid(y[3:4])
    # scale: 0.1 * softplus (3 channels)
    o_ref[0, 4:7, :] = 0.1 * _softplus(y[4:7])
    # rotation: F.normalize over 4 channels -> explicit per-lane sum of squares
    r = y[7:11]
    ss = r[0:1] * r[0:1] + r[1:2] * r[1:2] + r[2:3] * r[2:3] + r[3:4] * r[3:4]
    o_ref[0, 7:11, :] = r * jax.lax.rsqrt(jnp.maximum(ss, 1e-24))
    # rgb: 0.5 * tanh + 0.5 (3 channels)
    o_ref[0, 11:14, :] = 0.5 * jnp.tanh(y[11:14]) + 0.5


def gaussian_head(x_cm, conv_w, bias_col, spatial_tile=16384):
    """x_cm: (B*V, 14, S*S) channel-major features (NCHW flattened, no transpose).
    conv_w: (14, 14) = (out_ch, in_ch), bias_col: (14, 1).
    Returns (B*V, 14, S*S) channel-major gaussians (consumer does any relayout)."""
    BV, C, SS = x_cm.shape
    ts = _pick_tile(SS, spatial_tile)
    return pl.pallas_call(
        gaussian_head_kernel,
        out_shape=jax.ShapeDtypeStruct((BV, C, SS), jnp.float32),
        grid_spec=pltpu.PrefetchScalarGridSpec(
            num_scalar_prefetch=0,
            grid=(BV, SS // ts),
            in_specs=[
                pl.BlockSpec((1, C, ts), lambda i, j: (i, 0, j)),
                pl.BlockSpec((C, C), lambda i, j: (0, 0)),
                pl.BlockSpec((C, 1), lambda i, j: (0, 0)),
            ],
            out_specs=pl.BlockSpec((1, C, ts), lambda i, j: (i, 0, j)),
        ),
        compiler_params=pltpu.CompilerParams(
            dimension_semantics=("parallel", "parallel")),
    )(x_cm, conv_w, bias_col)


# ----------------------------------------------------------------------------
# Kernel 2: tiled background compositing + per-view sum-of-squares for
#           MSE(image) + MSE(alpha) + PSNR (finalize in the JAX wrapper)
# ----------------------------------------------------------------------------
def loss_kernel(pred_ref, gt_ref, mask_ref, alpha_ref, img_ss_ref, a_ss_ref):
    c = pl.program_id(1)

    # Per-view accumulators live in the resident output blocks (index_map is
    # constant along the c axis), so the BV axis stays "parallel".
    @pl.when(c == 0)
    def _():
        img_ss_ref[...] = jnp.zeros_like(img_ss_ref)
        a_ss_ref[...] = jnp.zeros_like(a_ss_ref)

    mask = mask_ref[0]                                 # (1, CB)
    # bg_color = ones(3): gt = gt*mask + 1*(1-mask); mask broadcast over 3 ch
    gt_comp = gt_ref[0] * mask + (1.0 - mask)          # (3, CB)
    d_img = pred_ref[0] - gt_comp
    d_a = alpha_ref[0] - mask                          # (1, CB)

    img_ss_ref[...] += jnp.sum(d_img * d_img, keepdims=True)[None]
    a_ss_ref[...] += jnp.sum(d_a * d_a, keepdims=True)[None]


def render_loss(pred_images, pred_alphas, gt_images, gt_masks, col_tile=65536):
    B, V, _, H, W = pred_images.shape
    BV, HW = B * V, H * W
    # Contiguous (free) reshapes; the 3x mask broadcast stays inside the kernel.
    pred = pred_images.reshape(BV, 3, HW)
    gt = gt_images.reshape(BV, 3, HW)
    mask = gt_masks.reshape(BV, 1, HW)
    alpha = pred_alphas.reshape(BV, 1, HW)

    cb = _pick_tile(HW, col_tile)   # default: full row per step (overhead amortized)

    out_bv = jax.ShapeDtypeStruct((BV, 1, 1), jnp.float32)
    acc_spec = pl.BlockSpec((1, 1, 1), lambda r, c: (r, 0, 0))
    img_ss, a_ss = pl.pallas_call(
        loss_kernel,
        out_shape=(out_bv, out_bv),
        grid_spec=pltpu.PrefetchScalarGridSpec(
            num_scalar_prefetch=0,
            grid=(BV, HW // cb),
            in_specs=[
                pl.BlockSpec((1, 3, cb), lambda r, c: (r, 0, c)),
                pl.BlockSpec((1, 3, cb), lambda r, c: (r, 0, c)),
                pl.BlockSpec((1, 1, cb), lambda r, c: (r, 0, c)),
                pl.BlockSpec((1, 1, cb), lambda r, c: (r, 0, c)),
            ],
            out_specs=(acc_spec, acc_spec),
        ),
        compiler_params=pltpu.CompilerParams(
            dimension_semantics=("parallel", "arbitrary")),
    )(pred, gt, mask, alpha)

    # Tiny finalize on (BV,1,1) arrays: cross-view sum, normalize, log10.
    mse_img = jnp.sum(img_ss) / float(BV * 3 * HW)
    mse_a = jnp.sum(a_ss) / float(BV * HW)
    loss = mse_img + mse_a
    psnr = -10.0 * jnp.log10(mse_img)
    return loss, psnr


# ----------------------------------------------------------------------------
if __name__ == "__main__":
    key = jax.random.PRNGKey(0)
    B, V, splat = 2, 4, 16          # batch, input views, opt.splat_size
    Vo, out_size = 2, 16            # output views, opt.output_size
    k1, k2, k3, k4, k5, k6, k7 = jax.random.split(key, 7)

    # Deterministic params for nn.Conv2d(14, 14, kernel_size=1)
    conv_w = 0.1 * jax.random.normal(k1, (14, 14), dtype=jnp.float32)  # (out, in)
    conv_b = 0.1 * jax.random.normal(k2, (14,), dtype=jnp.float32)

    # TODO(synk): UNet backbone (core.unet.UNet, 9->14 ch) is external to the
    # snippet; the kernel consumes its 14-channel (B*V, 14, S, S) NCHW output.
    unet_feat = jax.random.normal(k3, (B * V, 14, splat, splat), dtype=jnp.float32)

    # NCHW is already channel-major: a free reshape feeds the kernel; no
    # wrapper-side HBM transpose of the activation tensor.
    x_cm = unet_feat.reshape(B * V, 14, splat * splat)
    gaussians_cm = gaussian_head(x_cm, conv_w, conv_b.reshape(14, 1))
    # TODO(synk): GaussianRenderer (gsplat CUDA rasterizer) is external; the
    # channel-major (B*V, 14, S*S) output is handed to it directly and the
    # (B, N, 14) relayout is folded into that consumer (avoids an extra HBM
    # round trip of the full gaussian tensor).

    # Pure-JAX reference for the gaussian head (correctness check, channel-major).
    x_flat = jnp.transpose(unet_feat, (0, 2, 3, 1)).reshape(-1, 14)
    y_ref = x_flat @ conv_w.T + conv_b
    pos_r = jnp.clip(y_ref[:, 0:3], -1.0, 1.0)
    opa_r = jax.nn.sigmoid(y_ref[:, 3:4])
    scl_r = 0.1 * jax.nn.softplus(y_ref[:, 4:7])
    rot_r = y_ref[:, 7:11]
    rot_r = rot_r / jnp.maximum(
        jnp.sqrt(jnp.sum(rot_r * rot_r, axis=-1, keepdims=True)), 1e-12)
    rgb_r = 0.5 * jnp.tanh(y_ref[:, 11:14]) + 0.5
    ref = jnp.concatenate([pos_r, opa_r, scl_r, rot_r, rgb_r], axis=-1)
    ref_cm = jnp.transpose(
        ref.reshape(B * V, splat * splat, 14), (0, 2, 1))          # (BV, 14, S*S)
    assert bool(jnp.allclose(gaussians_cm, ref_cm, atol=1e-4, rtol=1e-4))

    # TODO(synk): GaussianRenderer (gsplat CUDA rasterizer) and LPIPS(vgg) have
    # no Pallas equivalent; rendered images/alphas below are synthetic stand-ins.
    pred_images = jax.nn.sigmoid(
        jax.random.normal(k4, (B, Vo, 3, out_size, out_size), dtype=jnp.float32))
    pred_alphas = jax.nn.sigmoid(
        jax.random.normal(k5, (B, Vo, 1, out_size, out_size), dtype=jnp.float32))
    gt_images = jax.random.uniform(
        k6, (B, Vo, 3, out_size, out_size), dtype=jnp.float32)
    gt_masks = (jax.random.uniform(
        k7, (B, Vo, 1, out_size, out_size)) > 0.5).astype(jnp.float32)

    loss_mse, psnr = render_loss(pred_images, pred_alphas, gt_images, gt_masks)
    loss = loss_mse  # opt.lambda_lpips == 0, opt.lambda_flow == 0 in this config

    # Pure-JAX reference for the loss path.
    gt_comp_ref = gt_images * gt_masks + 1.0 * (1.0 - gt_masks)
    mse_img_ref = jnp.mean((pred_images - gt_comp_ref) ** 2)
    mse_a_ref = jnp.mean((pred_alphas - gt_masks) ** 2)
    assert bool(jnp.allclose(loss_mse, mse_img_ref + mse_a_ref, atol=1e-4, rtol=1e-4))
    assert bool(jnp.allclose(psnr, -10.0 * jnp.log10(mse_img_ref), atol=1e-3, rtol=1e-4))

    jax.block_until_ready((gaussians_cm, loss, psnr))
    print("KERNEL_OK")
</pallas_src>

<mosaic_0001>
module attributes {stable_mosaic.version = 11 : i64} {
  func.func @gaussian_head_kernel(%arg0: i32, %arg1: i32, %arg2: memref<1x14x256xf32, #tpu.memory_space<vmem>>, %arg3: memref<14x14xf32, #tpu.memory_space<vmem>>, %arg4: memref<14x1xf32, #tpu.memory_space<vmem>>, %arg5: memref<1x14x256xf32, #tpu.memory_space<vmem>>) attributes {dimension_semantics = [#tpu.dimension_semantics<parallel>, #tpu.dimension_semantics<parallel>], iteration_bounds = array<i64: 8, 1>, scalar_prefetch = 0 : i64, scratch_operands = 0 : i64, tpu.core_type = #tpu.core_type<tc>, window_params = [{transform_indices = @transform_0, window_bounds = array<i64: 1, 14, 256>}, {pipeline_mode = #tpu.pipeline_mode<synchronous>, transform_indices = @transform_1, window_bounds = array<i64: 14, 14>}, {pipeline_mode = #tpu.pipeline_mode<synchronous>, transform_indices = @transform_2, window_bounds = array<i64: 14, 1>}, {transform_indices = @transform_3, window_bounds = array<i64: 1, 14, 256>}]} {
    %c0 = arith.constant 0 : index
    %c0_0 = arith.constant 0 : index
    %c0_1 = arith.constant 0 : index
    %0 = vector.load %arg2[%c0, %c0_0, %c0_1] : memref<1x14x256xf32, #tpu.memory_space<vmem>>, vector<1x14x256xf32>
    %1 = vector.shape_cast %0 : vector<1x14x256xf32> to vector<14x256xf32>
    %c0_2 = arith.constant 0 : index
    %c0_3 = arith.constant 0 : index
    %2 = vector.load %arg3[%c0_2, %c0_3] : memref<14x14xf32, #tpu.memory_space<vmem>>, vector<14x14xf32>
    %cst = arith.constant dense<0.000000e+00> : vector<14x256xf32>
    %3 = tpu.matmul %2, %1, %cst {dimension_numbers = #tpu.dot_dimension_numbers<[1], [0], [0], [1], [0, 0, 1, 1], [], []>} : vector<14x14xf32>, vector<14x256xf32>, vector<14x256xf32> -> vector<14x256xf32>
    %c0_4 = arith.constant 0 : index
    %c0_5 = arith.constant 0 : index
    %4 = vector.load %arg4[%c0_4, %c0_5] : memref<14x1xf32, #tpu.memory_space<vmem>>, vector<14x1xf32>
    %5 = vector.broadcast %4 : vector<14x1xf32> to vector<14x256xf32>
    %6 = arith.addf %3, %5 : vector<14x256xf32>
    %7 = vector.extract_strided_slice %6 {offsets = [0, 0], sizes = [3, 256], strides = [1, 1]} : vector<14x256xf32> to vector<3x256xf32>
    %cst_6 = arith.constant -1.000000e+00 : f32
    %cst_7 = arith.constant 1.000000e+00 : f32
    %8 = vector.broadcast %cst_6 : f32 to vector<3x256xf32>
    %9 = arith.maximumf %8, %7 : vector<3x256xf32>
    %10 = vector.broadcast %cst_7 : f32 to vector<3x256xf32>
    %11 = arith.minimumf %10, %9 : vector<3x256xf32>
    %c0_8 = arith.constant 0 : index
    %c0_9 = arith.constant 0 : index
    %c0_10 = arith.constant 0 : index
    %12 = vector.load %arg5[%c0_8, %c0_9, %c0_10] : memref<1x14x256xf32, #tpu.memory_space<vmem>>, vector<1x3x256xf32>
    %13 = vector.shape_cast %12 : vector<1x3x256xf32> to vector<3x256xf32>
    %14 = vector.shape_cast %11 : vector<3x256xf32> to vector<1x3x256xf32>
    tpu.vector_store %arg5[%c0_8, %c0_9, %c0_10], %14 {strides = array<i32>} : memref<1x14x256xf32, #tpu.memory_space<vmem>>, vector<1x3x256xf32>,
    %15 = vector.extract_strided_slice %6 {offsets = [3, 0], sizes = [1, 256], strides = [1, 1]} : vector<14x256xf32> to vector<1x256xf32>
    %16 = arith.negf %15 : vector<1x256xf32>
    %17 = math.exp %16 : vector<1x256xf32>
    %cst_11 = arith.constant 1.000000e+00 : f32
    %18 = vector.broadcast %cst_11 : f32 to vector<1x256xf32>
    %19 = arith.addf %18, %17 : vector<1x256xf32>
    %20 = arith.divf %18, %19 : vector<1x256xf32>
    %c0_12 = arith.constant 0 : index
    %c3 = arith.constant 3 : index
    %c0_13 = arith.constant 0 : index
    %21 = vector.load %arg5[%c0_12, %c3, %c0_13] : memref<1x14x256xf32, #tpu.memory_space<vmem>>, vector<1x1x256xf32>
    %22 = vector.shape_cast %21 : vector<1x1x256xf32> to vector<1x256xf32>
    %23 = vector.shape_cast %20 : vector<1x256xf32> to vector<1x1x256xf32>
    tpu.vector_store %arg5[%c0_12, %c3, %c0_13], %23 {strides = array<i32>} : memref<1x14x256xf32, #tpu.memory_space<vmem>>, vector<1x1x256xf32>,
    %24 = vector.extract_strided_slice %6 {offsets = [4, 0], sizes = [3, 256], strides = [1, 1]} : vector<14x256xf32> to vector<3x256xf32>
    %cst_14 = arith.constant 2.000000e+01 : f32
    %25 = vector.broadcast %cst_14 : f32 to vector<3x256xf32>
    %26 = arith.cmpf ogt, %24, %25 : vector<3x256xf32>
    %cst_15 = arith.constant 2.000000e+01 : f32
    %27 = vector.broadcast %cst_15 : f32 to vector<3x256xf32>
    %28 = arith.minimumf %24, %27 : vector<3x256xf32>
    %29 = math.exp %28 : vector<3x256xf32>
    %30 = math.log1p %29 : vector<3x256xf32>
    %31 = arith.select %26, %24, %30 : vector<3x256xi1>, vector<3x256xf32>
    %cst_16 = arith.constant 1.000000e-01 : f32
    %32 = vector.broadcast %cst_16 : f32 to vector<3x256xf32>
    %33 = arith.mulf %32, %31 : vector<3x256xf32>
    %c0_17 = arith.constant 0 : index
    %c4 = arith.constant 4 : index
    %c0_18 = arith.constant 0 : index
    %34 = vector.load %arg5[%c0_17, %c4, %c0_18] : memref<1x14x256xf32, #tpu.memory_space<vmem>>, vector<1x3x256xf32>
    %35 = vector.shape_cast %34 : vector<1x3x256xf32> to vector<3x256xf32>
    %36 = vector.shape_cast %33 : vector<3x256xf32> to vector<1x3x256xf32>
    tpu.vector_store %arg5[%c0_17, %c4, %c0_18], %36 {strides = array<i32>} : memref<1x14x256xf32, #tpu.memory_space<vmem>>, vector<1x3x256xf32>,
    %37 = vector.extract_strided_slice %6 {offsets = [7, 0], sizes = [4, 256], strides = [1, 1]} : vector<14x256xf32> to vector<4x256xf32>
    %38 = vector.extract_strided_slice %37 {offsets = [0, 0], sizes = [1, 256], strides = [1, 1]} : vector<4x256xf32> to vector<1x256xf32>
    %39 = vector.extract_strided_slice %37 {offsets = [0, 0], sizes = [1, 256], strides = [1, 1]} : vector<4x256xf32> to vector<1x256xf32>
    %40 = arith.mulf %38, %39 : vector<1x256xf32>
    %41 = vector.extract_strided_slice %37 {offsets = [1, 0], sizes = [1, 256], strides = [1, 1]} : vector<4x256xf32> to vector<1x256xf32>
    %42 = vector.extract_strided_slice %37 {offsets = [1, 0], sizes = [1, 256], strides = [1, 1]} : vector<4x256xf32> to vector<1x256xf32>
    %43 = arith.mulf %41, %42 : vector<1x256xf32>
    %44 = arith.addf %40, %43 : vector<1x256xf32>
    %45 = vector.extract_strided_slice %37 {offsets = [2, 0], sizes = [1, 256], strides = [1, 1]} : vector<4x256xf32> to vector<1x256xf32>
    %46 = vector.extract_strided_slice %37 {offsets = [2, 0], sizes = [1, 256], strides = [1, 1]} : vector<4x256xf32> to vector<1x256xf32>
    %47 = arith.mulf %45, %46 : vector<1x256xf32>
    %48 = arith.addf %44, %47 : vector<1x256xf32>
    %49 = vector.extract_strided_slice %37 {offsets = [3, 0], sizes = [1, 256], strides = [1, 1]} : vector<4x256xf32> to vector<1x256xf32>
    %50 = vector.extract_strided_slice %37 {offsets = [3, 0], sizes = [1, 256], strides = [1, 1]} : vector<4x256xf32> to vector<1x256xf32>
    %51 = arith.mulf %49, %50 : vector<1x256xf32>
    %52 = arith.addf %48, %51 : vector<1x256xf32>
    %cst_19 = arith.constant 1.000000e-24 : f32
    %53 = vector.broadcast %cst_19 : f32 to vector<1x256xf32>
    %54 = arith.maximumf %52, %53 : vector<1x256xf32>
    %55 = math.rsqrt %54 : vector<1x256xf32>
    %56 = vector.broadcast %55 : vector<1x256xf32> to vector<4x256xf32>
    %57 = arith.mulf %37, %56 : vector<4x256xf32>
    %c0_20 = arith.constant 0 : index
    %c7 = arith.constant 7 : index
    %c0_21 = arith.constant 0 : index
    %58 = vector.load %arg5[%c0_20, %c7, %c0_21] : memref<1x14x256xf32, #tpu.memory_space<vmem>>, vector<1x4x256xf32>
    %59 = vector.shape_cast %58 : vector<1x4x256xf32> to vector<4x256xf32>
    %60 = vector.shape_cast %57 : vector<4x256xf32> to vector<1x4x256xf32>
    tpu.vector_store %arg5[%c0_20, %c7, %c0_21], %60 {strides = array<i32>} : memref<1x14x256xf32, #tpu.memory_space<vmem>>, vector<1x4x256xf32>,
    %61 = vector.extract_strided_slice %6 {offsets = [11, 0], sizes = [3, 256], strides = [1, 1]} : vector<14x256xf32> to vector<3x256xf32>
    %62 = math.tanh %61 : vector<3x256xf32>
    %cst_22 = arith.constant 5.000000e-01 : f32
    %63 = vector.broadcast %cst_22 : f32 to vector<3x256xf32>
    %64 = arith.mulf %63, %62 : vector<3x256xf32>
    %cst_23 = arith.constant 5.000000e-01 : f32
    %65 = vector.broadcast %cst_23 : f32 to vector<3x256xf32>
    %66 = arith.addf %64, %65 : vector<3x256xf32>
    %c0_24 = arith.constant 0 : index
    %c11 = arith.constant 11 : index
    %c0_25 = arith.constant 0 : index
    %67 = vector.load %arg5[%c0_24, %c11, %c0_25] : memref<1x14x256xf32, #tpu.memory_space<vmem>>, vector<1x3x256xf32>
    %68 = vector.shape_cast %67 : vector<1x3x256xf32> to vector<3x256xf32>
    %69 = vector.shape_cast %66 : vector<3x256xf32> to vector<1x3x256xf32>
    tpu.vector_store %arg5[%c0_24, %c11, %c0_25], %69 {strides = array<i32>} : memref<1x14x256xf32, #tpu.memory_space<vmem>>, vector<1x3x256xf32>,
    return
  }
  func.func @transform_0(%arg0: i32, %arg1: i32) -> (i32, i32, i32) {
    %c0_i32 = arith.constant 0 : i32
    %c0_i32_0 = arith.constant 0 : i32
    return %arg0, %c0_i32, %arg1 : i32, i32, i32
  }
  func.func @transform_1(%arg0: i32, %arg1: i32) -> (i32, i32) {
    %c0_i32 = arith.constant 0 : i32
    %c0_i32_0 = arith.constant 0 : i32
    %c0_i32_1 = arith.constant 0 : i32
    return %c0_i32, %c0_i32_0 : i32, i32
  }
  func.func @transform_2(%arg0: i32, %arg1: i32) -> (i32, i32) {
    %c0_i32 = arith.constant 0 : i32
    %c0_i32_0 = arith.constant 0 : i32
    %c0_i32_1 = arith.constant 0 : i32
    return %c0_i32, %c0_i32_0 : i32, i32
  }
  func.func @transform_3(%arg0: i32, %arg1: i32) -> (i32, i32, i32) {
    %c0_i32 = arith.constant 0 : i32
    %c0_i32_0 = arith.constant 0 : i32
    return %arg0, %c0_i32, %arg1 : i32, i32, i32
  }
}

</mosaic_0001>

<bundles_post_ra>
// kernel: tpu_custom_call.1
= control target key start
LH: loop header
LB: loop body
LE: loop exit
PB: predicated region body
PF: predicated region fallthrough
CT: control target
= control target key end

     0   :  { %s660_s12 = smov 0   ;;  %s662_s13 = smov 0   ;;  %s755_s0 = inlined_call_operand.vmem [shape: f32[8,14,256], index: 0, kind: input, shape index: {}]   ;;  %s756_s1 = inlined_call_operand.vmem [shape: f32[14,14], index: 1, kind: input, shape index: {}]   ;;  %s757_s2 = inlined_call_operand.vmem [shape: f32[14,1], index: 2, kind: input, shape index: {}]   ;;  %s758_s3 = inlined_call_operand.vmem [shape: f32[8,14,256], index: 3, kind: output, shape index: {}]  }
   0x1   :  { %s664_s14 = smov 0  }
   0x2 LB: > { %s25_s15 = sadd.s32 1, %s631_s13  ;;  %p539_p0 = scmp.ge.s32.totalorder %s635_s14, 1  ;;  %s635_s14 = sphi %s664_s14, %s13_s14   ;;  %s631_s13 = sphi %s662_s13, %s760_s13   ;;  %s627_s12 = sphi %s660_s12, %s759_s12  }
   0x3   : > { %p27_p1 = scmp.ge.s32.totalorder %s25_s15, 8  ;;  %p158_p2 = scmp.lt.s32.totalorder %s635_s14, 9 }
   0x5   : > { %s762_s15 = smov (%p27_p1, %s25_s15), 0  ;;  %p159_p3 = pnand %p539_p0, %p158_p2 }
   0x6   : > { %p191_p4 = scmp.lt.s32.totalorder (!%p159_p3), %s627_s12, 7 }
   0x7   : > { %162 = sbr.rel (%p159_p3) target bundleno = 262 (0x106), region = 32 }
   0xc   : > { %v637_v0 = vmov 0.0   ;;  %v216_v1 = vld [vmem:[%s757_s2] sm:$0xff]  ;;  %s764_s12 = smov (!%p191_p4, %s627_s12), 7  ;;  %v638_v2 = vmov 0   ;;  %vm235_vm0 = vcmask 1045504   ;;  %vm228_vm1 = vcmask 113664  }
   0xd   : > { %306 = vmatprep.mubr.f32.mxu0 %v637_v0  ;;  %312 = vmatprep.mubr.f32.mxu1 %v637_v0  ;;  %s555_s18 = sshll.u32 %s764_s12, 5  ;;  %v214_v7 = vld [vmem:[%s756_s1] sm:$0xff]  ;;  %v215_v8 = vld [vmem:[%s756_s1 + $0x8] sm:$0x3f]  ;;  %v343_v47 = vlaneseq }
   0xe   : > { %588 = vset.pattern.permute.xlu0 %v638_v2  ;;  %s198_s21 = scalar_lea.vmem %s755_s0, %s555_s18  ;;  %v217_v9 = vld [vmem:[%s757_s2 + $0x8] sm:$0x3f]  ;;  %s703_s30 = scalar_lea.vmem %s758_s3, %s555_s18 }
   0xf   : > { %220 = vperm.xlu0 %588, %v216_v1   ;;  %v213_v3 = vld [vmem:[%s198_s21 + $0x18] sm:$0x3f]  ;;  %v212_v4 = vld [vmem:[%s198_s21 + $0x10] sm:$0x3f]  ;;  %v211_v5 = vld [vmem:[%s198_s21 + $0x8] sm:$0xff]  ;;  %v344_v56 = vshrl.u32 %v343_v47, 7 }
  0x10   : > { %544 = vmatprep.subr.msk.mxu0 %vm235_vm0, %v213_v3  ;;  %557 = vmatprep.subr.msk.mxu1 %vm235_vm0, %v213_v3  ;;  %v210_v6 = vld [vmem:[%s198_s21] sm:$0xff]  ;;  %v639_v1 = vmov 1966171168   ;;  %vm359_vm6 = vcmp.lt.s32.totalorder %v343_v47, 256 }
  0x11   : > { %545 = vmatpush1.msk.msra.mxu0 %vm235_vm0, %v212_v4  ;;  %559 = vmatpush1.msk.msra.mxu1 %vm235_vm0, %v212_v4  ;;  %v426_v62 = vsub.s32 7, %v344_v56  ;;  %v341_v2 = vunpack.c.l.s4 %v639_v1 }
  0x12   : > { %272 = vmatprep.subr.mxu0 %v211_v5  ;;  %558 = vmatprep.subr.mxu1 %v211_v5 }
  0x13   : > { %273 = vmatpush1.msra.mxu0 %v210_v6  ;;  %560 = vmatpush1.msra.mxu1 %v210_v6 }
  0x14   : > { %546 = vmatmul.mubr.msk.f32.vlgmr.msra.gmra.mxu0 %vm228_vm1, %v214_v7  ;;  %547 = vmatmul.mubr.msk.f32.vlgmr.msra.gmra.mxu1 %vm228_vm1, %v215_v8  ;;  %v342_v8 = vunpack.c.0.s8 %v341_v2 }
  0x15   : > { %225 = vperm.xlu0 %588, %v217_v9  }
  0x8a   : > { %v221_v10 = vpop.permute.xlu0 %220 }
  0x90   : > { %v226_v11 = vpop.permute.xlu0 %225 }
  0xd4   : > { %v308_v12 = vpop.f32.mrf.mxu0  ;;  %v314_v13 = vpop.f32.mrf.mxu1 }
  0xd5   : > { %v696_v14 = vadd.f32 %v308_v12, %v221_v10  ;;  %v698_v15 = vadd.f32 %v314_v13, %v226_v11 }
  0xd6   : > { %v310_v16 = vpop.f32.mrf.mxu0  ;;  %v316_v17 = vpop.f32.mrf.mxu1 }
  0xd7   : > { %v548_v18 = vclamps-f32 %v696_v14, 1.0  ;;  %v550_v19 = vmul.f32 -1.442695, %v696_v14  ;;  %v366_v20 = vmin.f32 %v696_v14, 20.0  ;;  %v398_v21 = vmul.f32 %v698_v15, %v698_v15 }
  0xd8   : > { %589 = vtanh.f32 %v698_v15  ;;  %v711_v22 = vadd.f32 %v310_v16, %v221_v10  ;;  %v714_v24 = vadd.f32 %v316_v17, %v226_v11  ;;  %v396_v25 = vmul.f32 %v696_v14, %v696_v14 }
  0xd9   : > { %323 = vst [vmem:[%s703_s30] sm:$0x7] %v548_v18  ;;  %591 = vpow2.f32 %v550_v19  ;;  %v368_v23 = vmul.f32 1.442695, %v366_v20  ;;  %v402_v26 = vrot.slane %v398_v21, 1  ;;  %v408_v27 = vrot.slane %v398_v21, 2 }
  0xda   : > { %v549_v28 = vclamps-f32 %v711_v22, 1.0  ;;  %v551_v29 = vmul.f32 -1.442695, %v711_v22  ;;  %v367_v30 = vmin.f32 %v711_v22, 20.0  ;;  %v399_v32 = vmul.f32 %v714_v24, %v714_v24 }
  0xdb   : > { %593 = vpow2.f32 %v368_v23  ;;  %v406_v31 = vadd.f32 %v402_v26, %v396_v25  ;;  %v414_v35 = vrot.slane %v398_v21, 3  ;;  %v397_v36 = vmul.f32 %v711_v22, %v711_v22 }
  0xdc   : > { %324 = vst [vmem:[%s703_s30 + $0x8] sm:$0x7] %v549_v28  ;;  %595 = vtanh.f32 %v714_v24  ;;  %v370_v33 = vmul.f32 1.442695, %v367_v30  ;;  %v403_v37 = vrot.slane %v399_v32, 1  ;;  %v409_v40 = vrot.slane %v399_v32, 2 }
  0xdd   : > { %597 = vpow2.f32 %v551_v29  ;;  %v412_v34 = vadd.f32 %v408_v27, %v406_v31  ;;  %v415_v43 = vrot.slane %v399_v32, 3  ;;  %v345_v20 = vsub.s32 %v342_v8, %v344_v56 }
  0xde   : > { %599 = vpow2.f32 %v370_v33  ;;  %v407_v39 = vadd.f32 %v403_v37, %v397_v36  ;;  %vm364_vm3 = vcmp.gt.f32.partialorder %v696_v14, 20.0  ;;  %vm365_vm5 = vcmp.gt.f32.partialorder %v711_v22, 20.0 }
  0xdf   : > { %v418_v38 = vadd.f32 %v414_v35, %v412_v34 }
  0xe0   : > { %v413_v42 = vadd.f32 %v409_v40, %v407_v39 }
  0xe1   : > { %v420_v41 = vmax.f32 %v418_v38, 1e-24 }
  0xe2   : > { %v419_v44 = vadd.f32 %v415_v43, %v413_v42 }
  0xe3   : > { %601 = vrsqrt.f32 %v420_v41 }
  0xe4   : > { %v421_v49 = vmax.f32 %v419_v44, 1e-24 }
  0xe5   : > { %v590_v45 = vpop.eup %589 }
  0xe6   : > { %v592_v46 = vpop.eup %591  ;;  %v442_v48 = vmul.f32 0.5, %v590_v45  ;;  %603 = vrsqrt.f32 %v421_v49 }
  0xe7   : > { %v331_v51 = vadd.f32 1.0, %v592_v46 }
  0xe8   : > { %v594_v50 = vpop.eup %593  ;;  %v444_v52 = vadd.f32 0.5, %v442_v48 }
  0xe9   : > { %v596_v53 = vpop.eup %595  ;;  %v372_v54 = vadd.f32 1.0, %v594_v50  ;;  %v375_v0 = vmul.f32 -0.5, %v594_v50  ;;  %v378_v10 = vand.u32 2147483647, %v594_v50 }
  0xea   : > { %v598_v55 = vpop.eup %597  ;;  %446 = vst [vmem:[%s703_s30 + $0x10] sm:$0x38] %v444_v52  ;;  %v443_v57 = vmul.f32 0.5, %v596_v53 }
  0xeb   : > { %605 = vlog2.f32 %v372_v54  ;;  %v332_v58 = vadd.f32 1.0, %v598_v55  ;;  %v600_v59 = vpop.eup %599  ;;  %v376_v7 = vadd.f32 1.0, %v375_v0  ;;  %vm379_vm2 = vcmp.lt.f32.partialorder %v378_v10, 0.0004427343 }
  0xec   : > { %607 = vrcp.f32 %v331_v51  ;;  %v445_v60 = vadd.f32 0.5, %v443_v57  ;;  %v381_v61 = vadd.f32 1.0, %v600_v59  ;;  %v384_v9 = vmul.f32 -0.5, %v600_v59 }
  0xed   : > { %609 = vrcp.f32 %v332_v58  ;;  %v377_v19 = vmul.f32 %v594_v50, %v376_v7  ;;  %v387_v23 = vand.u32 2147483647, %v600_v59 }
  0xee   : > { %447 = vst [vmem:[%s703_s30 + $0x18] sm:$0x38] %v445_v60  ;;  %611 = vlog2.f32 %v381_v61 }
  0xef   : > { %vm388_vm4 = vcmp.lt.f32.partialorder %v387_v23, 0.0004427343 }
  0xf0   : > { %v602_v63 = vpop.eup %601 }
  0xf1   : > { %v427_v3 = vrot.slane %v602_v63, %v426_v62 }
  0xf3   : > { %v432_v4 = vmul.f32 %v427_v3, %v696_v14  ;;  %v434_v5 = vmul.f32 %v427_v3, %v698_v15  ;;  %v604_v6 = vpop.eup %603  ;;  %v385_v15 = vadd.f32 1.0, %v384_v9 }
  0xf4   : > { %v431_v11 = vrot.slane %v604_v6, %v426_v62 }
  0xf5   : > { %436 = vst [vmem:[%s703_s30] sm:$0x80] %v432_v4  ;;  %438 = vst [vmem:[%s703_s30 + $0x10] sm:$0x7] %v434_v5  ;;  %v386_v31 = vmul.f32 %v600_v59, %v385_v15 }
  0xf6   : > { %v433_v13 = vmul.f32 %v431_v11, %v711_v22  ;;  %v435_v16 = vmul.f32 %v431_v11, %v714_v24 }
  0xf8   : > { %v606_v12 = vpop.eup %605  ;;  %437 = vst [vmem:[%s703_s30 + $0x8] sm:$0x80] %v433_v13  ;;  %439 = vst [vmem:[%s703_s30 + $0x18] sm:$0x7] %v435_v16 }
  0xf9   : > { %v608_v17 = vpop.eup %607  ;;  %v374_v18 = vmul.f32 0.6931472, %v606_v12 }
  0xfa   : > { %v610_v21 = vpop.eup %609 }
  0xfb   : > { %v380_v25 = vsel %vm379_vm2, %v377_v19, %v374_v18  ;;  %v339_v26 = vcombine.low %v608_v17, %v610_v21  ;;  %v612_v27 = vpop.eup %611 }
  0xfc   : > { %v390_v28 = vsel %vm364_vm3, %v696_v14, %v380_v25  ;;  %v383_v30 = vmul.f32 0.6931472, %v612_v27 }
  0xfd   : > { %v392_v24 = vmul.f32 0.1, %v390_v28  ;;  %v346_v29 = vrot.slane %v339_v26, %v345_v20 }
  0xfe   : > { %v389_v33 = vsel %vm388_vm4, %v386_v31, %v383_v30 }
  0xff   : > { %394 = vst [vmem:[%s703_s30] sm:$0x70] %v392_v24  ;;  %v347_v32 = vcombine.high %v346_v29, %v346_v29  ;;  %v391_v34 = vsel %vm365_vm5, %v711_v22, %v389_v33 }
 0x100   : > { %v393_v36 = vmul.f32 0.1, %v391_v34 }
 0x101   : > { %v354_v35 = vrot.slane %v347_v32, %v345_v20 }
 0x102   : > { %395 = vst [vmem:[%s703_s30 + $0x8] sm:$0x70] %v393_v36 }
 0x103   : > { %v355_v37 = vcombine.high %v354_v35, %v354_v35 }
 0x105   : > { %552 = vst.msk [vmem:[%s703_s30 + $0x3] ss:$8 sm:$0x3] %vm359_vm6, %v355_v37 }
 0x106 PF: > { %s13_s14 = sadd.s32 1, %s635_s14   ;;  %s759_s12 = smov %s631_s13 }
 0x107   : > { %p10_p5 = scmp.ge.s32.totalorder %s13_s14, 10   ;;  %s760_s13 = smov %s762_s15 }
 0x109   :  { %12 = sbr.rel (!%p10_p5) target bundleno = 2 (0x2), region = 63 }

</bundles_post_ra>
